<compile_context>
chip_gen: v7x
topology: tpu7x:2x2x1
jax: 0.10.0
libtpu: 0.0.40
codegen_flags: <defaults>
</compile_context>

<pallas_src>
import jax
import jax.numpy as jnp
from jax.experimental import pallas as pl
from jax.experimental.pallas import tpu as pltpu


# ---------------------------------------------------------------------------
# Kernels
# ---------------------------------------------------------------------------

def _ffn_resident_kernel(x_ref, w1_ref, b1_ref, w2_ref, b2_ref, o_ref):
    """Weights-resident fast path: full W1/W2 held in VMEM, grid = (M tiles,)."""
    x = x_ref[...].astype(w1_ref.dtype)          # per-tile cast (MXU operand dtype)
    h = jnp.dot(x, w1_ref[...], preferred_element_type=jnp.float32)
    h = jnp.maximum(h + b1_ref[...], 0.0)        # bias + ReLU in f32 on the VPU
    y = jnp.dot(h.astype(w2_ref.dtype), w2_ref[...],
                preferred_element_type=jnp.float32)
    o_ref[...] = (y + b2_ref[...]).astype(o_ref.dtype)


def _ffn_stream_f32out_kernel(x_ref, w1_ref, b1_ref, w2_ref, b2_ref, o_ref):
    """Hidden-streamed path, f32 output: accumulate directly into o_ref."""
    h_idx = pl.program_id(1)

    # Fold the second bias into the accumulator init.
    @pl.when(h_idx == 0)
    def _init():
        o_ref[...] = jnp.broadcast_to(b2_ref[...], o_ref.shape)

    x = x_ref[...].astype(w1_ref.dtype)
    h = jnp.dot(x, w1_ref[...], preferred_element_type=jnp.float32)
    h = jnp.maximum(h + b1_ref[...], 0.0)
    o_ref[...] += jnp.dot(h.astype(w2_ref.dtype), w2_ref[...],
                          preferred_element_type=jnp.float32)


def _ffn_stream_acc_kernel(x_ref, w1_ref, b1_ref, w2_ref, b2_ref, o_ref,
                           acc_ref):
    """Hidden-streamed path, low-precision output: f32 accumulator scratch."""
    h_idx = pl.program_id(1)

    @pl.when(h_idx == 0)
    def _init():
        acc_ref[...] = jnp.broadcast_to(b2_ref[...], acc_ref.shape)

    x = x_ref[...].astype(w1_ref.dtype)
    h = jnp.dot(x, w1_ref[...], preferred_element_type=jnp.float32)
    h = jnp.maximum(h + b1_ref[...], 0.0)
    acc_ref[...] += jnp.dot(h.astype(w2_ref.dtype), w2_ref[...],
                            preferred_element_type=jnp.float32)

    @pl.when(h_idx == pl.num_programs(1) - 1)
    def _finalize():
        o_ref[...] = acc_ref[...].astype(o_ref.dtype)


# ---------------------------------------------------------------------------
# VMEM sizing / schedule selection
# ---------------------------------------------------------------------------

def _tpu_vmem_defaults():
    """Generation-dependent (budget, compiler limit) in bytes."""
    cap = None
    try:
        info = pltpu.get_tpu_info()
        cap = int(getattr(info, "vmem_capacity_bytes", 0)) or None
    except Exception:
        cap = None
    if cap is None:
        cap = 64 << 20                         # be conservative (v7x-sized)
    if cap >= 100 << 20:                       # v5e / v6e: 128 MiB physical
        return 64 << 20, 98 << 20
    return 28 << 20, 48 << 20                  # v7x: 64 MiB per TensorCore


def _resident_vmem_bytes(bm, dim, hidden, in_isz, w_isz, out_isz):
    x_tiles = 2 * bm * dim * in_isz            # double-buffered x tiles
    o_tiles = 2 * bm * dim * out_isz           # double-buffered out tiles
    weights = 2 * (2 * dim * hidden * w_isz)   # W1 + W2 (counted 2x: buffers)
    biases = 2 * (hidden + dim) * 4
    inter = bm * hidden * (4 + w_isz)          # f32 h + its low-precision cast
    x_cast = bm * dim * w_isz
    return x_tiles + o_tiles + weights + biases + inter + x_cast


def _stream_vmem_bytes(bm, bh, dim, hidden, in_isz, w_isz, out_isz, use_acc):
    x_tiles = 2 * bm * dim * in_isz
    o_tiles = 2 * bm * dim * out_isz
    w_tiles = 2 * 2 * dim * bh * w_isz         # W1/W2 slices, double-buffered
    biases = 2 * (bh + dim) * 4
    inter = bm * bh * (4 + w_isz)              # f32 h + cast copy
    x_cast = bm * dim * w_isz
    acc = bm * dim * 4 if use_acc else 0
    return x_tiles + o_tiles + w_tiles + biases + inter + x_cast + acc


def _m_candidates(M, sublane, block_m):
    if block_m is not None:
        return [block_m]
    cands = [c for c in (1024, 512, 256, 128, 64, 32, 16, 8)
             if c % sublane == 0 and M % c == 0]
    return cands or [M]                        # full extent is always legal


def _h_candidates(hidden, block_h):
    if block_h is not None:
        return [block_h]
    cands = [c for c in (2048, 1024, 512, 256, 128) if hidden % c == 0]
    return cands or [hidden]


def _select_schedule(M, dim, hidden, in_isz, w_isz, out_isz, use_acc,
                     block_m, block_h, budget, sublane):
    m_cands = _m_candidates(M, sublane, block_m)

    # ---- weights-resident fast path (only when block_h is not forced) ----
    if block_h is None:
        for bm in m_cands:
            if _resident_vmem_bytes(bm, dim, hidden,
                                    in_isz, w_isz, out_isz) <= budget:
                # Prefer >= 2 M tiles so the parallel axis can shard across the
                # two v7x TensorCores (per-step overhead ~0.35us is negligible).
                if M // bm < 2:
                    half = bm // 2
                    if (half >= sublane and half % sublane == 0
                            and M % half == 0):
                        bm = half
                return "resident", bm, None

    # ---- hidden-streamed path: biggest bm first (divides weight re-stream),
    #      then the deepest hidden slice that fits ----
    h_cands = _h_candidates(hidden, block_h)
    for bm in m_cands:
        for bh in h_cands:
            if _stream_vmem_bytes(bm, bh, dim, hidden, in_isz, w_isz,
                                  out_isz, use_acc) <= budget:
                return "stream", bm, bh
    # Last resort: smallest tiles (may exceed the stated budget; the compiler
    # limit still has headroom over the budget).
    return "stream", m_cands[-1], h_cands[-1]


# ---------------------------------------------------------------------------
# Public wrapper
# ---------------------------------------------------------------------------

def feed_forward(x, w1, b1, w2, b2, *, block_m=None, block_h=None,
                 matmul_dtype=None, vmem_budget_bytes=None,
                 vmem_limit_bytes=None):
    """Apply the FeedForward module to x of shape (..., dim)."""
    dim = x.shape[-1]
    hidden = w1.shape[1]
    assert w1.shape == (dim, hidden) and w2.shape == (hidden, dim)
    assert b1.shape == (hidden,) and b2.shape == (dim,)

    lead = x.shape[:-1]
    M = 1
    for d in lead:
        M *= d
    out_dtype = x.dtype

    x2d = x.reshape(M, dim)
    # Weights are cast once (cold path, parameters); x is cast per-tile inside
    # the kernel so the activations make no extra HBM round trip.
    if matmul_dtype is not None:
        w1 = w1.astype(matmul_dtype)
        w2 = w2.astype(matmul_dtype)
    b1_2d = b1.reshape(1, hidden).astype(jnp.float32)
    b2_2d = b2.reshape(1, dim).astype(jnp.float32)

    in_isz = jnp.dtype(x2d.dtype).itemsize
    w_isz = jnp.dtype(w1.dtype).itemsize
    out_isz = jnp.dtype(out_dtype).itemsize

    default_budget, default_limit = _tpu_vmem_defaults()
    if vmem_budget_bytes is None:
        vmem_budget_bytes = default_budget
    if vmem_limit_bytes is None:
        vmem_limit_bytes = default_limit

    # Sub-32-bit MXU operands pack along sublanes: prefer block_m % 16 then.
    sublane = 8 if (in_isz >= 4 and w_isz >= 4) else 16
    use_acc = out_dtype != jnp.float32

    mode, bm, bh = _select_schedule(M, dim, hidden, in_isz, w_isz, out_isz,
                                    use_acc, block_m, block_h,
                                    vmem_budget_bytes, sublane)

    # (8, 128) layout constraints (full-extent blocks are always legal).
    assert M % bm == 0 and (bm % 8 == 0 or bm == M)

    flops = 4 * M * dim * hidden               # two matmuls
    bias_bytes = 4 * (hidden + dim)

    if mode == "resident":
        grid = (M // bm,)
        cost = pl.CostEstimate(
            flops=flops, transcendentals=0,
            bytes_accessed=(M * dim * (in_isz + out_isz)
                            + 2 * dim * hidden * w_isz + bias_bytes))
        out2d = pl.pallas_call(
            _ffn_resident_kernel,
            out_shape=jax.ShapeDtypeStruct((M, dim), out_dtype),
            grid_spec=pltpu.PrefetchScalarGridSpec(
                num_scalar_prefetch=0,
                grid=grid,
                in_specs=[
                    pl.BlockSpec((bm, dim), lambda i: (i, 0)),       # x tile
                    pl.BlockSpec((dim, hidden), lambda i: (0, 0)),   # W1 (held)
                    pl.BlockSpec((1, hidden), lambda i: (0, 0)),     # b1
                    pl.BlockSpec((hidden, dim), lambda i: (0, 0)),   # W2 (held)
                    pl.BlockSpec((1, dim), lambda i: (0, 0)),        # b2
                ],
                out_specs=pl.BlockSpec((bm, dim), lambda i: (i, 0)),
            ),
            compiler_params=pltpu.CompilerParams(
                dimension_semantics=("parallel",),
                vmem_limit_bytes=vmem_limit_bytes),
            cost_estimate=cost,
        )(x2d, w1, b1_2d, w2, b2_2d)
        return out2d.reshape(*lead, dim)

    # -------- hidden-streamed fallback --------
    assert hidden % bh == 0 and (bh % 128 == 0 or bh == hidden)
    grid = (M // bm, hidden // bh)
    n_m_tiles = M // bm
    cost = pl.CostEstimate(
        flops=flops, transcendentals=0,
        bytes_accessed=(M * dim * (in_isz + out_isz)
                        + n_m_tiles * 2 * dim * hidden * w_isz + bias_bytes))

    in_specs = [
        pl.BlockSpec((bm, dim), lambda i, h: (i, 0)),    # x tile
        pl.BlockSpec((dim, bh), lambda i, h: (0, h)),    # W1 slice
        pl.BlockSpec((1, bh), lambda i, h: (0, h)),      # b1 slice
        pl.BlockSpec((bh, dim), lambda i, h: (h, 0)),    # W2 slice
        pl.BlockSpec((1, dim), lambda i, h: (0, 0)),     # b2
    ]
    out_spec = pl.BlockSpec((bm, dim), lambda i, h: (i, 0))

    if use_acc:
        kernel = _ffn_stream_acc_kernel
        scratch = [pltpu.VMEM((bm, dim), jnp.float32)]
    else:
        kernel = _ffn_stream_f32out_kernel
        scratch = []

    out2d = pl.pallas_call(
        kernel,
        out_shape=jax.ShapeDtypeStruct((M, dim), out_dtype),
        grid_spec=pltpu.PrefetchScalarGridSpec(
            num_scalar_prefetch=0,
            grid=grid,
            in_specs=in_specs,
            out_specs=out_spec,
            scratch_shapes=scratch,
        ),
        compiler_params=pltpu.CompilerParams(
            dimension_semantics=("parallel", "arbitrary"),
            vmem_limit_bytes=vmem_limit_bytes),
        cost_estimate=cost,
    )(x2d, w1, b1_2d, w2, b2_2d)
    return out2d.reshape(*lead, dim)


def init_feed_forward_params(key, dim, hidden_dim, dtype=jnp.float32):
    """Deterministic init mimicking nn.Linear's uniform(-1/sqrt(fan_in), ...)."""
    k1, k2, k3, k4 = jax.random.split(key, 4)
    bound1 = 1.0 / (dim ** 0.5)
    bound2 = 1.0 / (hidden_dim ** 0.5)
    # Stored as (in_features, out_features) so the kernel does x @ W.
    w1 = jax.random.uniform(k1, (dim, hidden_dim), dtype, -bound1, bound1)
    b1 = jax.random.uniform(k2, (hidden_dim,), dtype, -bound1, bound1)
    w2 = jax.random.uniform(k3, (hidden_dim, dim), dtype, -bound2, bound2)
    b2 = jax.random.uniform(k4, (dim,), dtype, -bound2, bound2)
    return w1, b1, w2, b2


if __name__ == "__main__":
    key = jax.random.PRNGKey(0)
    kx, kp, kx2, kp2 = jax.random.split(key, 4)

    # --- Test 1: toy module shapes -> weights-resident fast path -----------
    batch, seq, dim, hidden_dim = 2, 8, 32, 64
    x = jax.random.normal(kx, (batch, seq, dim), jnp.float32)
    w1, b1, w2, b2 = init_feed_forward_params(kp, dim, hidden_dim)
    out = jax.block_until_ready(feed_forward(x, w1, b1, w2, b2))
    ref = jnp.maximum(x @ w1 + b1, 0.0) @ w2 + b2
    assert out.shape == x.shape
    assert jnp.allclose(out, ref, atol=1e-5, rtol=1e-5), "resident f32 mismatch"

    # --- Test 2: 128-aligned shapes, forced hidden-streaming (f32 out,
    #             accumulate directly into the output block) ----------------
    batch, seq, dim, hidden_dim = 2, 128, 128, 256
    x = jax.random.normal(kx2, (batch, seq, dim), jnp.float32)
    w1, b1, w2, b2 = init_feed_forward_params(kp2, dim, hidden_dim)
    ref = jnp.maximum(x @ w1 + b1, 0.0) @ w2 + b2
    out = jax.block_until_ready(
        feed_forward(x, w1, b1, w2, b2, block_m=128, block_h=128))
    assert jnp.allclose(out, ref, atol=2e-4, rtol=2e-4), "streamed f32 mismatch"

    # --- Test 3: streamed path with bf16 MXU operands, f32 accumulation ----
    out_bf16 = jax.block_until_ready(
        feed_forward(x, w1, b1, w2, b2, block_m=128, block_h=128,
                     matmul_dtype=jnp.bfloat16))
    assert jnp.allclose(out_bf16, ref, atol=1e-1, rtol=5e-2), "streamed bf16 mismatch"

    # --- Test 4: resident fast path with auto tiling on aligned shapes -----
    out_auto = jax.block_until_ready(feed_forward(x, w1, b1, w2, b2))
    assert jnp.allclose(out_auto, ref, atol=2e-4, rtol=2e-4), "resident auto mismatch"

    # --- Test 5: bf16 activations + bf16 MXU operands (acc-scratch path
    #             exercised only if streaming is forced; here resident) -----
    out_act16 = jax.block_until_ready(
        feed_forward(x.astype(jnp.bfloat16), w1, b1, w2, b2,
                     matmul_dtype=jnp.bfloat16))
    assert out_act16.dtype == jnp.bfloat16
    assert jnp.allclose(out_act16.astype(jnp.float32), ref,
                        atol=2e-1, rtol=1e-1), "bf16 activation mismatch"

    print("KERNEL_OK")
</pallas_src>

<mosaic_0001>
module attributes {stable_mosaic.version = 11 : i64} {
  func.func @_ffn_resident_kernel(%arg0: i32, %arg1: memref<8x32xf32, #tpu.memory_space<vmem>>, %arg2: memref<32x64xf32, #tpu.memory_space<vmem>>, %arg3: memref<1x64xf32, #tpu.memory_space<vmem>>, %arg4: memref<64x32xf32, #tpu.memory_space<vmem>>, %arg5: memref<1x32xf32, #tpu.memory_space<vmem>>, %arg6: memref<8x32xf32, #tpu.memory_space<vmem>>) attributes {dimension_semantics = [#tpu.dimension_semantics<parallel>], iteration_bounds = array<i64: 2>, scalar_prefetch = 0 : i64, scratch_operands = 0 : i64, tpu.core_type = #tpu.core_type<tc>, window_params = [{transform_indices = @transform_0, window_bounds = array<i64: 8, 32>}, {pipeline_mode = #tpu.pipeline_mode<synchronous>, transform_indices = @transform_1, window_bounds = array<i64: 32, 64>}, {pipeline_mode = #tpu.pipeline_mode<synchronous>, transform_indices = @transform_2, window_bounds = array<i64: 1, 64>}, {pipeline_mode = #tpu.pipeline_mode<synchronous>, transform_indices = @transform_3, window_bounds = array<i64: 64, 32>}, {pipeline_mode = #tpu.pipeline_mode<synchronous>, transform_indices = @transform_4, window_bounds = array<i64: 1, 32>}, {transform_indices = @transform_5, window_bounds = array<i64: 8, 32>}]} {
    %c0 = arith.constant 0 : index
    %c0_0 = arith.constant 0 : index
    %0 = vector.load %arg1[%c0, %c0_0] : memref<8x32xf32, #tpu.memory_space<vmem>>, vector<8x32xf32>
    %c0_1 = arith.constant 0 : index
    %c0_2 = arith.constant 0 : index
    %1 = vector.load %arg2[%c0_1, %c0_2] : memref<32x64xf32, #tpu.memory_space<vmem>>, vector<32x64xf32>
    %cst = arith.constant dense<0.000000e+00> : vector<8x64xf32>
    %2 = tpu.matmul %0, %1, %cst {dimension_numbers = #tpu.dot_dimension_numbers<[1], [0], [0], [1], [0, 0, 1, 1], [], []>} : vector<8x32xf32>, vector<32x64xf32>, vector<8x64xf32> -> vector<8x64xf32>
    %c0_3 = arith.constant 0 : index
    %c0_4 = arith.constant 0 : index
    %3 = vector.load %arg3[%c0_3, %c0_4] : memref<1x64xf32, #tpu.memory_space<vmem>>, vector<1x64xf32>
    %4 = vector.broadcast %3 : vector<1x64xf32> to vector<8x64xf32>
    %5 = arith.addf %2, %4 : vector<8x64xf32>
    %cst_5 = arith.constant 0.000000e+00 : f32
    %6 = vector.broadcast %cst_5 : f32 to vector<8x64xf32>
    %7 = arith.maximumf %5, %6 : vector<8x64xf32>
    %c0_6 = arith.constant 0 : index
    %c0_7 = arith.constant 0 : index
    %8 = vector.load %arg4[%c0_6, %c0_7] : memref<64x32xf32, #tpu.memory_space<vmem>>, vector<64x32xf32>
    %cst_8 = arith.constant dense<0.000000e+00> : vector<8x32xf32>
    %9 = tpu.matmul %7, %8, %cst_8 {dimension_numbers = #tpu.dot_dimension_numbers<[1], [0], [0], [1], [0, 0, 1, 1], [], []>} : vector<8x64xf32>, vector<64x32xf32>, vector<8x32xf32> -> vector<8x32xf32>
    %c0_9 = arith.constant 0 : index
    %c0_10 = arith.constant 0 : index
    %10 = vector.load %arg5[%c0_9, %c0_10] : memref<1x32xf32, #tpu.memory_space<vmem>>, vector<1x32xf32>
    %11 = vector.broadcast %10 : vector<1x32xf32> to vector<8x32xf32>
    %12 = arith.addf %9, %11 : vector<8x32xf32>
    %c0_11 = arith.constant 0 : index
    %c0_12 = arith.constant 0 : index
    %13 = vector.load %arg6[%c0_11, %c0_12] : memref<8x32xf32, #tpu.memory_space<vmem>>, vector<8x32xf32>
    tpu.vector_store %arg6[%c0_11, %c0_12], %12 {strides = array<i32>} : memref<8x32xf32, #tpu.memory_space<vmem>>, vector<8x32xf32>,
    return
  }
  func.func @transform_0(%arg0: i32) -> (i32, i32) {
    %c0_i32 = arith.constant 0 : i32
    %c0_i32_0 = arith.constant 0 : i32
    return %arg0, %c0_i32 : i32, i32
  }
  func.func @transform_1(%arg0: i32) -> (i32, i32) {
    %c0_i32 = arith.constant 0 : i32
    %c0_i32_0 = arith.constant 0 : i32
    %c0_i32_1 = arith.constant 0 : i32
    return %c0_i32, %c0_i32_0 : i32, i32
  }
  func.func @transform_2(%arg0: i32) -> (i32, i32) {
    %c0_i32 = arith.constant 0 : i32
    %c0_i32_0 = arith.constant 0 : i32
    %c0_i32_1 = arith.constant 0 : i32
    return %c0_i32, %c0_i32_0 : i32, i32
  }
  func.func @transform_3(%arg0: i32) -> (i32, i32) {
    %c0_i32 = arith.constant 0 : i32
    %c0_i32_0 = arith.constant 0 : i32
    %c0_i32_1 = arith.constant 0 : i32
    return %c0_i32, %c0_i32_0 : i32, i32
  }
  func.func @transform_4(%arg0: i32) -> (i32, i32) {
    %c0_i32 = arith.constant 0 : i32
    %c0_i32_0 = arith.constant 0 : i32
    %c0_i32_1 = arith.constant 0 : i32
    return %c0_i32, %c0_i32_0 : i32, i32
  }
  func.func @transform_5(%arg0: i32) -> (i32, i32) {
    %c0_i32 = arith.constant 0 : i32
    %c0_i32_0 = arith.constant 0 : i32
    return %arg0, %c0_i32 : i32, i32
  }
}

</mosaic_0001>

<bundles_post_ra>
// kernel: tpu_custom_call.1
= control target key start
LH: loop header
LB: loop body
LE: loop exit
PB: predicated region body
PF: predicated region fallthrough
CT: control target
= control target key end

     0   :  { %10 = vsyncpa [#allocation3], 0  ;;  %s830_s0 = inlined_call_operand.vmem [shape: f32[16,32], index: 0, kind: input, shape index: {}]   ;;  %s831_s1 = inlined_call_operand.vmem [shape: f32[32,64], index: 1, kind: input, shape index: {}]   ;;  %s832_s2 = inlined_call_operand.vmem [shape: f32[1,64], index: 2, kind: input, shape index: {}]   ;;  %s833_s3 = inlined_call_operand.vmem [shape: f32[64,32], index: 3, kind: input, shape index: {}]   ;;  %s834_s4 = inlined_call_operand.vmem [shape: f32[1,32], index: 4, kind: input, shape index: {}]   ;;  %s835_s5 = inlined_call_operand.hbm [shape: f32[16,32], index: 5, kind: output, shape index: {}]  }
   0x1   :  { %12 = vsyncpa [#allocation3 + $0x1], 0  ;;  %s686_s18 = smov 0   ;;  %s688_s19 = smov 0  }
   0x2   :  { %s690_s20 = smov 0   ;;  %s692_s21 = smov 0  }
   0x3 LB: > { %s707_s22 = sadd.s32 4294967295, %s650_s21   ;;  %s470_s23 = sadd.s32 4294967294, %s650_s21   ;;  %s650_s21 = sphi %s692_s21, %s841_s21   ;;  %s646_s20 = sphi %s690_s20, %s840_s20   ;;  %s642_s19 = sphi %s688_s19, %s839_s19   ;;  %s638_s18 = sphi %s686_s18, %s838_s18  }
   0x4   : > { %s711_s24 = sadd.s32 1, %s650_s21   ;;  %s135_s25 = sadd.s32 1, %s646_s20 }
   0x5   : > { %s132_s26 = ssub.s32 %s650_s21, %s711_s24  ;;  %p145_p0 = scmp.ne.s32.totalorder %s646_s20, %s642_s19 }
   0x6   : > { %p133_p1 = scmp.eq.s32.totalorder %s132_s26, 0  ;;  %p146_p2 = scmp.eq.s32.totalorder %s707_s22, 1 }
   0x7   : > { %p151_p3 = scmp.ne.s32.totalorder %s642_s19, %s638_s18  ;;  %p152_p4 = scmp.eq.s32.totalorder %s470_s23, 1 }
   0x8   : > { %s722_s27 = scalar_select %p133_p1, %s646_s20, %s135_s25  }
   0x9   : > { %p724_p5 = por %p146_p2, %p145_p0  ;;  %p728_p6 = por %p152_p4, %p151_p3 }
   0xa   : > { %p473_p7 = scmp.ge.s32.totalorder %s650_s21, 1  ;;  %p189_p8 = scmp.lt.s32.totalorder %s650_s21, 3 }
   0xc   : > { %p190_p9 = pnand %p473_p7, %p189_p8 }
   0xd   : > { %v221_v0 = vld [vmem:[%s831_s1] sm:$0xff] (!%p190_p9)  ;;  %v222_v1 = vld [vmem:[%s831_s1 + $0x8] sm:$0xff] (!%p190_p9)  ;;  %v223_v2 = vld [vmem:[%s831_s1 + $0x10] sm:$0xff] (!%p190_p9)  ;;  %v652_v3 = vmov (!%p190_p9), 0.0|0.0   ;;  %vm653_vm0 = vmmov (!%p190_p9), 0   ;;  %v654_v6 = vmov (!%p190_p9), 0.0  }
   0xe   : > { %193 = sbr.rel (%p190_p9) target bundleno = 470 (0x1d6), region = 40  ;;  %528 = vmatprep.subr.bf16.mxu0 (!%p190_p9), %v652_v3  ;;  %v529_v4 = vpack.c.bf16 (!%p190_p9), %v222_v1, %v221_v0  ;;  %v224_v5 = vld [vmem:[%s831_s1 + $0x18] sm:$0xff] (!%p190_p9)  ;;  %506 = vmatprep.mubr.msk.f32.mxu0 (!%p190_p9), %vm653_vm0, %v654_v6  ;;  %p216_p10 = scmp.lt.s32.totalorder (!%p190_p9), %s707_s22, 1  ;;  %v307_v7 = vld [vmem:[%s833_s3] sm:$0xff] (!%p190_p9)  ;;  %v308_v8 = vld [vmem:[%s833_s3 + $0x8] sm:$0xff] (!%p190_p9)  ;;  %vm232_vm1 = vcmask (!%p190_p9), 261120  }
   0xf   : > { %534 = vmatprep.subr.bf16.mxu1 (!%p190_p9), %v652_v3  ;;  %v535_v9 = vpack.c.bf16 (!%p190_p9), %v308_v8, %v307_v7  ;;  %v309_v10 = vld [vmem:[%s833_s3 + $0x10] sm:$0xff] (!%p190_p9)  ;;  %v310_v11 = vld [vmem:[%s833_s3 + $0x18] sm:$0xff] (!%p190_p9)  ;;  %525 = vmatprep.mubr.msk.f32.mxu1 (!%p190_p9), %vm653_vm0, %v654_v6  ;;  %v532_v12 = vpack.c.bf16 (!%p190_p9), %v224_v5, %v223_v2  ;;  %v311_v14 = vld [vmem:[%s833_s3 + $0x20] sm:$0xff] (!%p190_p9)  ;;  %vm322_vm2 = vcmask (!%p190_p9), 523264   ;;  %s213_s26 = sand.u32 (!%p190_p9), 1, %s642_s19   ;;  %s481_s8 = sshll.u32 (!%p190_p9), %s707_s22, 7 }
  0x10   : > { %530 = vmatpush3.bf16.msra.mxu0 (!%p190_p9), %v529_v4  ;;  %v538_v13 = vpack.c.bf16 (!%p190_p9), %v310_v11, %v309_v10  ;;  %v312_v15 = vld [vmem:[%s833_s3 + $0x28] sm:$0xff] (!%p190_p9)  ;;  %v313_v18 = vld [vmem:[%s833_s3 + $0x30] sm:$0xff] (!%p190_p9)  ;;  %v314_v19 = vld [vmem:[%s833_s3 + $0x38] sm:$0xff] (!%p190_p9)  ;;  %s398_s14 = scalar_lea.sflag (!%p190_p9), [#allocation3], %s213_s26 }
  0x11   : > { %531 = vmatprep.subr.bf16.mxu0 (!%p190_p9), %v652_v3  ;;  %536 = vmatpush3.bf16.msra.mxu1 (!%p190_p9), %v535_v9  ;;  %v541_v17 = vpack.c.bf16 (!%p190_p9), %v312_v15, %v311_v14  ;;  %v544_v20 = vpack.c.bf16 (!%p190_p9), %v314_v19, %v313_v18  ;;  %v476_v21 = vld [vmem:[%s832_s2] ss:$0 sm:$0xff] (!%p190_p9) }
  0x12   : > { %537 = vmatprep.subr.bf16.mxu1 (!%p190_p9), %v652_v3  ;;  %v478_v26 = vld [vmem:[%s834_s4] ss:$0 sm:$0xff] (!%p190_p9) }
  0x14   : > { %533 = vmatpush3.bf16.msra.mxu0 (!%p190_p9), %v532_v12 }
  0x15   : > { %s217_s30 = scalar_select %p216_p10, %s707_s22, 1  ;;  %539 = vmatpush3.bf16.msra.mxu1 %v538_v13 }
  0x16   : > { %540 = vmatprep.subr.bf16.mxu1 %v652_v3  ;;  %s655_s22 = smov [#allocation2]  }
  0x17   : > { %s475_s6 = sshll.u32 %s217_s30, 3  ;;  %s474_s30 = sshll.u32 %s213_s26, 3 }
  0x18   : > { %s219_s13 = scalar_lea.vmem %s830_s0, %s475_s6  ;;  %s215_s9 = scalar_lea.vmem [#allocation2], %s474_s30 }
  0x19   : > { %v220_v16 = vld [vmem:[%s219_s13] sm:$0xff]  ;;  %542 = vmatpush3.bf16.msra.mxu1 %v541_v17  ;;  %s411_s10 = sshll.u32 %s215_s9, 4  ;;  %s787_s13 = scalar_lea.hbm %s835_s5, %s481_s8  ;;  %s789_s10 = int_to_ptr.vmem [resolvable:$true] %s411_s10 }
  0x1a   : > { %507 = vmatmul.mubr.msk.f32.vlgmr.msra.gmra.mrb[0].mxu0 %vm232_vm1, %v220_v16  ;;  %543 = vmatprep.subr.bf16.mxu1 %v652_v3  ;;  %s588_s15 = scalar_lea.vmem %s789_s10, 128  ;;  %s592_s16 = sshll.u32 %s655_s22, 4  ;;  %s593_s16 = int_to_ptr.vmem [resolvable:$false] %s592_s16 }
  0x1b   : > { %p589_p11 = scmp.ne.s32.totalorder %s789_s10, %s588_s15  ;;  %s594_s17 = scalar_lea.vmem %s593_s16, 256 }
  0x1c   : > { %p595_p0 = scmp.lt.s32.totalorder %s789_s10, %s593_s16  ;;  %p596_p1 = scmp.lt.s32.totalorder %s594_s17, %s588_s15 }
  0x1d   : > { %545 = vmatpush3.bf16.msra.mxu1 %v544_v20  ;;  %p590_p12 = pnand %p589_p11, %p724_p5 }
  0x1e   : > { %p597_p2 = por %p596_p1, %p595_p0 }
  0x1f   : > { %p591_p13 = pneg %p590_p12 }
  0x21   : > { %p598_p3 = pnand %p597_p2, %p591_p13 }
  0xed   : > { %v302_v22 = vpop.f32.mrb[0].mxu0 }
  0xee   : > { %v303_v23 = vadd.f32 %v476_v21, %v302_v22  ;;  %v508_v24 = vpop.f32.mrb[1].mxu0 }
  0xf0   : > { %v306_v25 = vmax.f32 %v303_v23, 0.0 }
  0xf2   : > { %526 = vmatmul.mubr.msk.f32.vlgmr.msra.gmra.mrb[0].mxu1 %vm322_vm2, %v306_v25 }
 0x1c5   : > { %v392_v27 = vpop.f32.mrb[0].mxu1 }
 0x1c6   : > { %v393_v28 = vadd.f32 %v478_v26, %v392_v27  ;;  %v527_v29 = vpop.f32.mrb[1].mxu1 }
 0x1c8   : > { %396 = vst.msk [vmem:[%s215_s9] sm:$0xff] %vm232_vm1, %v393_v28 }
 0x1c9   : > { %601 = shalt.err (!%p598_p3)
}
 0x1ca   : > { %s602_s23 = scalar_lea.hbm %s787_s13, 128  ;;  %s606_s30 = scalar_lea.hbm %s835_s5, 256 }
 0x1cb   : > { %p603_p4 = scmp.ne.s32.totalorder %s787_s13, %s602_s23  ;;  %p607_p9 = scmp.lt.u32.totalorder %s787_s13, %s835_s5 }
 0x1cc   : > { %p608_p10 = scmp.lt.u32.totalorder %s606_s30, %s602_s23  ;;  %p610_p12 = scmp.lt.u32.totalorder %s602_s23, %s787_s13 }
 0x1cd   : > { %p604_p7 = pnand %p603_p4, %p724_p5 }
 0x1ce   : > { %p609_p11 = por %p608_p10, %p607_p9 }
 0x1cf   : > { %p605_p8 = pneg %p604_p7 }
 0x1d0   : > { %p611_p13 = por %p610_p12, %p609_p11 }
 0x1d2   : > { %p612_p0 = pnand %p611_p13, %p605_p8 }
 0x1d4   : > { %615 = shalt.err (!%p612_p0)
}
 0x1d5   : > { %546 = dma.vmem_to_hbm [thread:$0]  (%p724_p5), %s789_s10, 128, %s787_s13, %s398_s14  }
 0x1d6 PF: > { %p552_p1 = scmp.ge.s32.totalorder %s650_s21, 2  ;;  %s423_s8 = sand.u32 1, %s638_s18  }
 0x1d7   : > { %s424_s9 = scalar_lea.sflag [#allocation3], %s423_s8 }
 0x1d8   : > { %p549_p2 = pnand %p552_p1, %p728_p6 }
 0x1da   : > { %633 = dma.done.wait (!%p549_p2), %s424_s9, 128  }
 0x1db   : > { %635 = vsyncadd (!%p549_p2), %s424_s9, 4294967168  ;;  %p15_p3 = scmp.ge.s32.totalorder %s711_s24, 4   ;;  %s838_s18 = smov %s642_s19 }
 0x1dc   : > { %s839_s19 = smov %s646_s20  ;;  %s840_s20 = smov %s722_s27 }
 0x1dd   : > { %s841_s21 = smov %s711_s24  ;;  %17 = sbr.rel (!%p15_p3) target bundleno = 3 (0x3), region = 75 }
 0x1e4   :  { %429 = vsyncpa [#allocation3], 1 }
 0x1e5   :  { %431 = vsyncpa [#allocation3 + $0x1], 1 }

</bundles_post_ra>
